<compile_context>
chip_gen: v7x
topology: tpu7x:2x2x1
jax: 0.10.0
libtpu: 0.0.40
codegen_flags: <defaults>
</compile_context>

<pallas_src>
import functools

import jax
import jax.numpy as jnp
from jax.experimental import pallas as pl
from jax.experimental.pallas import tpu as pltpu


def _accuracy_kernel(score_ref, ans_ref, out_ref, *, batch, tile_b,
                     blocks_per_split):
    c = pl.program_id(0)       # split index ("parallel"; maps to TCs on v7x)
    i = pl.program_id(1)       # batch-tile index within split ("arbitrary")

    # Per-split accumulator lives in the resident output block.
    @pl.when(i == 0)
    def _():
        out_ref[...] = jnp.zeros_like(out_ref)

    s = score_ref[...]         # (TB, C) native dtype (no wrapper up-cast)
    a = ans_ref[...]           # (TB, C) native dtype
    TB, C = s.shape

    col = jax.lax.broadcasted_iota(jnp.int32, (TB, C), 1)
    row = jax.lax.broadcasted_iota(jnp.int32, (TB, C), 0)

    # Logical (unclamped) block id -> global row ids; rows >= batch are padding
    # (ragged last tile or overflow block of the uneven core split).
    g = c * blocks_per_split + i
    global_row = row + g * tile_b

    # Row-wise argmax with lowest-index tie-break (matches jnp/torch argmax).
    # TODO(synk): rows containing NaN pick nothing (contribute 0), which
    # differs from torch.sort's NaN ordering.
    row_max = jnp.max(s, axis=1, keepdims=True)
    is_max = s == row_max
    big = jnp.int32(2 ** 30)
    arg_max = jnp.min(jnp.where(is_max, col, big), axis=1, keepdims=True)

    # Fused gather + batch reduction (single full-tile reduce), padding rows
    # masked out; accumulate in f32 regardless of input dtype.
    pick = (col == arg_max) & (global_row < batch)
    partial = jnp.sum(jnp.where(pick, a.astype(jnp.float32), jnp.float32(0.0)))

    out_ref[...] += partial


def accuracy(score, ans_idx, *, tile_b=None,
             vmem_budget_bytes=16 * 1024 * 1024):
    """score: [B, C], ans_idx: [B, C] (any float dtype) -> scalar float32."""
    assert score.ndim == 2 and score.shape == ans_idx.shape
    B, C = score.shape

    # Pick the batch-tile size: 2 inputs x 2 pipeline buffers must fit the
    # budget (safe on v7x's 64 MiB VMEM and v5e's raised scoped limit).
    itembytes = score.dtype.itemsize + ans_idx.dtype.itemsize
    if tile_b is None:
        cap = max(8, vmem_budget_bytes // (2 * C * itembytes))
        if B <= cap:
            tile_b = B                    # single block: equals full array dim
        else:
            tile_b = (cap // 8) * 8       # tiled: must be a multiple of 8

    total_blocks = pl.cdiv(B, tile_b)
    n_splits = 2 if total_blocks >= 2 else 1      # v7x: shard across both TCs
    blocks_per_split = pl.cdiv(total_blocks, n_splits)

    def in_map(c, i):
        # Clamp the DMA block index; overflow blocks are fully masked in-kernel.
        g = jnp.minimum(c * blocks_per_split + i, total_blocks - 1)
        return (g, 0)

    kernel = functools.partial(
        _accuracy_kernel, batch=B, tile_b=tile_b,
        blocks_per_split=blocks_per_split)

    partials = pl.pallas_call(
        kernel,
        out_shape=jax.ShapeDtypeStruct((n_splits, 8, 128), jnp.float32),
        grid_spec=pltpu.PrefetchScalarGridSpec(
            num_scalar_prefetch=0,
            grid=(n_splits, blocks_per_split),
            in_specs=[
                pl.BlockSpec((tile_b, C), in_map),
                pl.BlockSpec((tile_b, C), in_map),
            ],
            out_specs=pl.BlockSpec((1, 8, 128), lambda c, i: (c, 0, 0)),
        ),
        compiler_params=pltpu.CompilerParams(
            dimension_semantics=("parallel", "arbitrary"),
            vmem_limit_bytes=32 * 1024 * 1024,
        ),
    )(score, ans_idx)

    # Tiny final reduction (<= 2 scalars) + scaling by the true batch size.
    return jnp.sum(partials[:, 0, 0]) * (100.0 / B)


def _reference(score, ans_idx):
    # Pure-JAX reference mirroring the torch code.
    B = score.shape[0]
    idx = jnp.argmax(score, axis=1)
    top = jnp.take_along_axis(ans_idx, idx[:, None], axis=1)[:, 0]
    return jnp.sum(top.astype(jnp.float32)) * 100.0 / B


if __name__ == "__main__":
    key = jax.random.PRNGKey(0)
    k1, k2, k3, k4 = jax.random.split(key, 4)

    # Case 1: small, single-block path.
    B1, C1 = 8, 128
    score1 = jax.random.normal(k1, (B1, C1), dtype=jnp.float32)
    ans1 = jax.random.uniform(k2, (B1, C1), dtype=jnp.float32)  # VQA soft scores
    out1 = accuracy(score1, ans1)
    jax.block_until_ready(out1)
    ref1 = _reference(score1, ans1)
    assert jnp.allclose(out1, ref1, atol=1e-5, rtol=1e-5), (out1, ref1)

    # Case 2: ragged batch, forced small tile -> exercises batch tiling,
    # 2-way core split, block-index clamping and padding-row masking,
    # with bf16 score streamed without up-casting.
    B2, C2 = 40, 256
    score2 = jax.random.normal(k3, (B2, C2), dtype=jnp.bfloat16)
    ans2 = jax.random.uniform(k4, (B2, C2), dtype=jnp.float32)
    out2 = accuracy(score2, ans2, tile_b=16)
    jax.block_until_ready(out2)
    ref2 = _reference(score2, ans2)
    assert jnp.allclose(out2, ref2, atol=1e-4, rtol=1e-4), (out2, ref2)

    print("KERNEL_OK")
</pallas_src>

<mosaic_0001>
module attributes {stable_mosaic.version = 11 : i64} {
  func.func @_accuracy_kernel(%arg0: i32, %arg1: i32, %arg2: memref<8x128xf32, #tpu.memory_space<vmem>>, %arg3: memref<8x128xf32, #tpu.memory_space<vmem>>, %arg4: memref<1x8x128xf32, #tpu.memory_space<vmem>>) attributes {dimension_semantics = [#tpu.dimension_semantics<parallel>, #tpu.dimension_semantics<arbitrary>], iteration_bounds = array<i64: 1, 1>, scalar_prefetch = 0 : i64, scratch_operands = 0 : i64, tpu.core_type = #tpu.core_type<tc>, window_params = [{transform_indices = @transform_0, window_bounds = array<i64: 8, 128>}, {transform_indices = @transform_1, window_bounds = array<i64: 8, 128>}, {transform_indices = @transform_2, window_bounds = array<i64: 1, 8, 128>}]} {
    %c0_i32 = arith.constant 0 : i32
    %0 = arith.cmpi eq, %arg1, %c0_i32 : i32
    %1 = arith.extui %0 : i1 to i32
    %c0_i32_0 = arith.constant 0 : i32
    %2 = arith.cmpi ne, %1, %c0_i32_0 : i32
    scf.if %2 {
      %cst_14 = arith.constant 0.000000e+00 : f32
      %35 = vector.broadcast %cst_14 : f32 to vector<1x8x128xf32>
      %c0_15 = arith.constant 0 : index
      %c0_16 = arith.constant 0 : index
      %c0_17 = arith.constant 0 : index
      %36 = vector.load %arg4[%c0_15, %c0_16, %c0_17] : memref<1x8x128xf32, #tpu.memory_space<vmem>>, vector<1x8x128xf32>
      tpu.vector_store %arg4[%c0_15, %c0_16, %c0_17], %35 {strides = array<i32>} : memref<1x8x128xf32, #tpu.memory_space<vmem>>, vector<1x8x128xf32>,
    } else {
    }
    %c0 = arith.constant 0 : index
    %c0_1 = arith.constant 0 : index
    %3 = vector.load %arg2[%c0, %c0_1] : memref<8x128xf32, #tpu.memory_space<vmem>>, vector<8x128xf32>
    %c0_2 = arith.constant 0 : index
    %c0_3 = arith.constant 0 : index
    %4 = vector.load %arg3[%c0_2, %c0_3] : memref<8x128xf32, #tpu.memory_space<vmem>>, vector<8x128xf32>
    %5 = tpu.iota {dimensions = array<i32: 1>} : vector<8x128xi32>
    %6 = tpu.iota {dimensions = array<i32: 0>} : vector<8x128xi32>
    %c1_i32 = arith.constant 1 : i32
    %7 = arith.muli %arg0, %c1_i32 : i32
    %8 = arith.addi %7, %arg1 : i32
    %c8_i32 = arith.constant 8 : i32
    %9 = arith.muli %8, %c8_i32 : i32
    %10 = vector.broadcast %9 : i32 to vector<8x128xi32>
    %11 = arith.addi %6, %10 : vector<8x128xi32>
    %cst = arith.constant dense<0xFF800000> : vector<8xf32>
    %12 = vector.multi_reduction <maximumf>, %3, %cst [1] : vector<8x128xf32> to vector<8xf32>
    %13 = vector.shape_cast %12 : vector<8xf32> to vector<8x1xf32>
    %14 = vector.broadcast %13 : vector<8x1xf32> to vector<8x128xf32>
    %15 = arith.cmpf oeq, %3, %14 : vector<8x128xf32>
    %c1073741824_i32 = arith.constant 1073741824 : i32
    %16 = vector.broadcast %c1073741824_i32 : i32 to vector<8x128xi32>
    %17 = arith.select %15, %5, %16 : vector<8x128xi1>, vector<8x128xi32>
    %cst_4 = arith.constant dense<2147483647> : vector<8xi32>
    %18 = vector.multi_reduction <minsi>, %17, %cst_4 [1] : vector<8x128xi32> to vector<8xi32>
    %19 = vector.shape_cast %18 : vector<8xi32> to vector<8x1xi32>
    %20 = vector.broadcast %19 : vector<8x1xi32> to vector<8x128xi32>
    %21 = arith.cmpi eq, %5, %20 : vector<8x128xi32>
    %c8_i32_5 = arith.constant 8 : i32
    %22 = vector.broadcast %c8_i32_5 : i32 to vector<8x128xi32>
    %23 = arith.cmpi slt, %11, %22 : vector<8x128xi32>
    %24 = arith.andi %21, %23 : vector<8x128xi1>
    %cst_6 = arith.constant 0.000000e+00 : f32
    %25 = vector.broadcast %cst_6 : f32 to vector<8x128xf32>
    %26 = arith.select %24, %4, %25 : vector<8x128xi1>, vector<8x128xf32>
    %27 = vector.shape_cast %26 : vector<8x128xf32> to vector<1x8x128xf32>
    %cst_7 = arith.constant dense<0.000000e+00> : vector<1xf32>
    %28 = vector.multi_reduction <add>, %27, %cst_7 [1, 2] : vector<1x8x128xf32> to vector<1xf32>
    %29 = vector.shape_cast %28 : vector<1xf32> to vector<1x1x1xf32>
    %30 = vector.extract %29[0, 0, 0] : f32 from vector<1x1x1xf32>
    %c0_8 = arith.constant 0 : index
    %c0_9 = arith.constant 0 : index
    %c0_10 = arith.constant 0 : index
    %31 = vector.load %arg4[%c0_8, %c0_9, %c0_10] : memref<1x8x128xf32, #tpu.memory_space<vmem>>, vector<1x8x128xf32>
    %32 = vector.broadcast %30 : f32 to vector<1x8x128xf32>
    %33 = arith.addf %31, %32 : vector<1x8x128xf32>
    %c0_11 = arith.constant 0 : index
    %c0_12 = arith.constant 0 : index
    %c0_13 = arith.constant 0 : index
    %34 = vector.load %arg4[%c0_11, %c0_12, %c0_13] : memref<1x8x128xf32, #tpu.memory_space<vmem>>, vector<1x8x128xf32>
    tpu.vector_store %arg4[%c0_11, %c0_12, %c0_13], %33 {strides = array<i32>} : memref<1x8x128xf32, #tpu.memory_space<vmem>>, vector<1x8x128xf32>,
    return
  }
  func.func @transform_0(%arg0: i32, %arg1: i32) -> (i32, i32) {
    %c1_i32 = arith.constant 1 : i32
    %0 = arith.muli %arg0, %c1_i32 : i32
    %1 = arith.addi %0, %arg1 : i32
    %c0_i32 = arith.constant 0 : i32
    %2 = arith.minsi %1, %c0_i32 : i32
    %c0_i32_0 = arith.constant 0 : i32
    %c0_i32_1 = arith.constant 0 : i32
    return %2, %c0_i32_0 : i32, i32
  }
  func.func @transform_1(%arg0: i32, %arg1: i32) -> (i32, i32) {
    %c1_i32 = arith.constant 1 : i32
    %0 = arith.muli %arg0, %c1_i32 : i32
    %1 = arith.addi %0, %arg1 : i32
    %c0_i32 = arith.constant 0 : i32
    %2 = arith.minsi %1, %c0_i32 : i32
    %c0_i32_0 = arith.constant 0 : i32
    %c0_i32_1 = arith.constant 0 : i32
    return %2, %c0_i32_0 : i32, i32
  }
  func.func @transform_2(%arg0: i32, %arg1: i32) -> (i32, i32, i32) {
    %c0_i32 = arith.constant 0 : i32
    %c0_i32_0 = arith.constant 0 : i32
    %c0_i32_1 = arith.constant 0 : i32
    return %arg0, %c0_i32, %c0_i32_0 : i32, i32, i32
  }
}

</mosaic_0001>

<bundles_post_ra>
// kernel: tpu_custom_call.1
= control target key start
LH: loop header
LB: loop body
LE: loop exit
PB: predicated region body
PF: predicated region fallthrough
CT: control target
= control target key end

     0   :  { %7 = vsyncpa [#allocation3], 0  ;;  %s254_s0 = inlined_call_operand.hbm [shape: f32[8,128], index: 0, kind: input, shape index: {}]   ;;  %s255_s1 = inlined_call_operand.hbm [shape: f32[8,128], index: 1, kind: input, shape index: {}]   ;;  %s256_s2 = inlined_call_operand.hbm [shape: f32[1,8,128], index: 2, kind: output, shape index: {}]  }
   0x1   :  { %8 = vsyncpa [#allocation6], 0 }
   0x2   :  { %9 = vsyncpa [#allocation4], 0  ;;  %s200_s9 = smov [#allocation2]   ;;  %s201_s11 = smov [#allocation5]  }
   0x3   :  { %s21_s10 = sshll.u32 %s200_s9, 4  ;;  %s36_s12 = sshll.u32 %s201_s11, 4  ;;  %s22_s10 = int_to_ptr.vmem [resolvable:$true] %s21_s10  ;;  %s37_s12 = int_to_ptr.vmem [resolvable:$true] %s36_s12 }
   0x4   :  { %s128_s15 = scalar_lea.hbm %s254_s0, 128 }
   0x5   :  { %p129_p0 = scmp.ne.s32.totalorder %s254_s0, %s128_s15  ;;  %p132_p1 = scmp.lt.u32.totalorder %s128_s15, %s254_s0 }
   0x7   :  { %p134_p2 = pnand %p132_p1, %p129_p0 }
   0x9   :  { %137 = shalt.err (!%p134_p2)
}
   0xa   :  { %s138_s20 = scalar_lea.vmem %s22_s10, 128  ;;  %p143_p4 = scmp.lt.s32.totalorder %s22_s10, %s22_s10 }
   0xb   :  { %p139_p3 = scmp.ne.s32.totalorder %s22_s10, %s138_s20  ;;  %p144_p5 = scmp.lt.s32.totalorder %s138_s20, %s138_s20 }
   0xd   :  { %p145_p6 = por %p144_p5, %p143_p4 }
   0xf   :  { %p146_p7 = pnand %p145_p6, %p139_p3 }
  0x11   :  { %149 = shalt.err (!%p146_p7)
}
  0x12   :  { %24 = dma.hbm_to_vmem [thread:$0]  %s254_s0, 128, %s22_s10, [#allocation3]  }
  0x13   :  { %s150_s25 = scalar_lea.hbm %s255_s1, 128 }
  0x14   :  { %p151_p8 = scmp.ne.s32.totalorder %s255_s1, %s150_s25  ;;  %p154_p9 = scmp.lt.u32.totalorder %s150_s25, %s255_s1 }
  0x16   :  { %p156_p10 = pnand %p154_p9, %p151_p8 }
  0x18   :  { %159 = shalt.err (!%p156_p10)
}
  0x19   :  { %s160_s30 = scalar_lea.vmem %s37_s12, 128  ;;  %p165_p12 = scmp.lt.s32.totalorder %s37_s12, %s37_s12 }
  0x1a   :  { %p161_p11 = scmp.ne.s32.totalorder %s37_s12, %s160_s30  ;;  %p166_p13 = scmp.lt.s32.totalorder %s160_s30, %s160_s30 }
  0x1c   :  { %p167_p0 = por %p166_p13, %p165_p12 }
  0x1e   :  { %p168_p1 = pnand %p167_p0, %p161_p11 }
  0x20   :  { %171 = shalt.err (!%p168_p1)
}
  0x21   :  { %39 = dma.hbm_to_vmem [thread:$0]  %s255_s1, 128, %s37_s12, [#allocation6]  }
  0x22   :  { %194 = dma.done.wait [#allocation3], 128  }
  0x23   :  { %195 = vsyncadd [#allocation3], 4294967168 }
  0x24   :  { %196 = dma.done.wait [#allocation6], 128  }
  0x25   :  { %197 = vsyncadd [#allocation6], 4294967168  ;;  %v57_v0 = vld [vmem:[#allocation2] sm:$0xff]  ;;  %v59_v1 = vlaneseq  ;;  %v58_v16 = vld [vmem:[#allocation5] sm:$0xff]  ;;  %s202_s1 = smov [#allocation7]  }
  0x26   :  { %67 = vmax.xlane.f32.xlu0 %v57_v0  ;;  %s108_s4 = sshll.u32 %s202_s1, 4  ;;  %s109_s4 = int_to_ptr.vmem [resolvable:$true] %s108_s4 }
  0x27   :  { %v60_v2 = vand.u32 127, %v59_v1  ;;  %s172_s6 = scalar_lea.vmem %s109_s4, 128  ;;  %p177_p3 = scmp.lt.s32.totalorder %s109_s4, %s109_s4 }
  0x28   :  { %p173_p2 = scmp.ne.s32.totalorder %s109_s4, %s172_s6  ;;  %p178_p4 = scmp.lt.s32.totalorder %s172_s6, %s172_s6 }
  0x2a   :  { %p179_p5 = por %p178_p4, %p177_p3 }
  0x2c   :  { %p180_p6 = pnand %p179_p5, %p173_p2 }
  0xb3   :  { %v68_v3 = vpop.xlane.xlu0 %67 }
  0xb4   :  { %vm69_vm0 = vcmp.eq.f32.partialorder %v57_v0, %v68_v3 }
  0xb5   :  { %v70_v4 = vsel %vm69_vm0, %v60_v2, 1073741824 }
  0xb6   :  { %v72_v5 = vshra.s32 %v70_v4, 16  ;;  %v71_v7 = vand.u32 65535, %v70_v4 }
  0xb8   :  { %v74_v6 = vcvt.s32.f32 %v72_v5  ;;  %v73_v9 = vcvt.s32.f32 %v71_v7 }
  0xba   :  { %75 = vmin.xlane.f32.xlu0 %v74_v6 }
 0x147   :  { %v76_v8 = vpop.xlane.xlu0 %75 }
 0x148   :  { %vm77_vm1 = vcmp.eq.f32.partialorder %v74_v6, %v76_v8  ;;  %v82_v11 = vcvt.f32.s32 %v76_v8 }
 0x149   :  { %v78_v10 = vsel %vm77_vm1, %v73_v9, inf }
 0x14a   :  { %79 = vmin.xlane.f32.xlu1 %v78_v10  ;;  %v83_v13 = vshll.u32 %v82_v11, 16 }
 0x1d7   :  { %v80_v12 = vpop.xlane.xlu1 %79 }
 0x1d8   :  { %v81_v14 = vcvt.f32.s32 %v80_v12 }
 0x1da   :  { %v84_v15 = vadd.s32 %v83_v13, %v81_v14 }
 0x1dc   :  { %vm85_vm2 = vcmp.eq.s32.totalorder %v60_v2, %v84_v15 }
 0x1dd   :  { %v88_v17 = vsel %vm85_vm2, %v58_v16, 0.0 }
 0x1de   :  { %89 = vadd.xlane.f32.xlu1 %v88_v17 }
 0x26b   :  { %v90_v18 = vpop.xlane.xlu1 %89 }
 0x26c   :  { %v91_v19 = vrot.slane %v90_v18, 4 }
 0x26e   :  { %v92_v20 = vadd.f32 %v91_v19, %v90_v18 }
 0x270   :  { %v93_v21 = vrot.slane %v92_v20, 2 }
 0x272   :  { %v94_v22 = vadd.f32 %v93_v21, %v92_v20 }
 0x274   :  { %v95_v23 = vrot.slane %v94_v22, 1 }
 0x276   :  { %v96_v24 = vadd.f32 %v95_v23, %v94_v22 }
 0x278   :  { %122 = vpush %v96_v24 }
 0x2a9   :  { %s123_s5 = spop %122 }
 0x2aa   :  { %v99_v25 = vstv %s123_s5 }
 0x2ab   :  { %101 = vst [vmem:[#allocation7] sm:$0xff] %v99_v25 }
 0x2ac   :  { %183 = shalt.err (!%p180_p6)
}
 0x2ad   :  { %s184_s9 = scalar_lea.hbm %s256_s2, 128 }
 0x2ae   :  { %p185_p7 = scmp.ne.s32.totalorder %s256_s2, %s184_s9  ;;  %p188_p8 = scmp.lt.u32.totalorder %s184_s9, %s256_s2 }
 0x2b0   :  { %p190_p9 = pnand %p188_p8, %p185_p7 }
 0x2b2   :  { %193 = shalt.err (!%p190_p9)
}
 0x2b3   :  { %111 = dma.vmem_to_hbm [thread:$0]  %s109_s4, 128, %s256_s2, [#allocation4]  }
 0x2b4   :  { %198 = dma.done.wait [#allocation4], 128  }
 0x2b5   :  { %199 = vsyncadd [#allocation4], 4294967168 }
 0x2b6   :  { %115 = vsyncpa [#allocation3], 1 }
 0x2b7   :  { %116 = vsyncpa [#allocation6], 1 }
 0x2b8   :  { %117 = vsyncpa [#allocation4], 1 }

</bundles_post_ra>
